<compile_context>
chip_gen: v7x
topology: tpu7x:2x2x1
jax: 0.10.0
libtpu: 0.0.40
codegen_flags: <defaults>
</compile_context>

<pallas_src>
import functools
import math

import jax
import jax.numpy as jnp
from jax.experimental import pallas as pl
from jax.experimental.pallas import tpu as pltpu

_EPS = 1e-5  # nn.LayerNorm default
_MiB = 1024 * 1024


def _layernorm(x, gamma, beta):
    mu = jnp.mean(x, axis=-1, keepdims=True)
    var = jnp.mean(jnp.square(x - mu), axis=-1, keepdims=True)
    return (x - mu) * jax.lax.rsqrt(var + _EPS) * gamma + beta


def pooling_kernel(c_ref, m_ref,
                   g1_ref, b1_ref,
                   kq_ref,
                   w_ref, bv_ref, bc_ref,
                   g2_ref, b2_ref,
                   o_ref, *, approx_recip):
    f32 = jnp.float32
    Bt, S, D = c_ref.shape

    x = c_ref[...].astype(f32)                          # (Bt, S, D) f32 compute
    m = m_ref[...]                                      # (Bt, S) f32
    valid = m > 0

    # --- norm1: LayerNorm over encoder_dim (f32 VPU/EUP) ---
    xn = _layernorm(x, g1_ref[...], b1_ref[...])        # (Bt, S, D)

    # --- attention scores: folded vector  sum_d xn * (q Wk^T / sqrt(D)) ---
    # (VPU mul + lane reduce; avoids a lane-width-1 MXU op + relayout.)
    kq = kq_ref[...].reshape(1, 1, D)                   # (1, 1, D)
    scores = jnp.sum(xn * kq, axis=-1)                  # (Bt, S)
    scores = jnp.where(valid, scores, f32(-1e30))

    smax = jnp.max(scores, axis=-1, keepdims=True)      # (Bt, 1)
    p = jnp.exp(scores - smax)
    p = jnp.where(valid, p, f32(0.0))
    denom = jnp.maximum(jnp.sum(p, axis=-1, keepdims=True), f32(1e-30))
    if approx_recip:
        attn = p * pl.reciprocal(denom, approx=True)    # (Bt, S)
    else:
        attn = p / denom
    asum = jnp.sum(attn, axis=-1, keepdims=True)        # (Bt, 1), == 1 if any valid

    # --- pool BEFORE any projection (VPU mul + reduce over S) ---
    pooled = jnp.sum(attn[:, :, None] * xn, axis=1)     # (Bt, D)

    # --- single fused projection  (Wv @ Wo @ Wp), f32 accumulation ---
    y = jnp.dot(pooled.astype(w_ref.dtype), w_ref[...],
                preferred_element_type=f32)             # (Bt, Dt)
    y = y + asum * bv_ref[...] + bc_ref[...]

    # --- norm2: LayerNorm over time_embed_dim ---
    o_ref[...] = _layernorm(y, g2_ref[...], b2_ref[...])


def _pick_block_b(B, S, D, Dt, cond_itemsize, w_itemsize, vmem_budget):
    """Largest batch tile that fits the VMEM budget, preferring >= 2 grid steps."""
    def step_bytes(bb):
        cond = 2 * bb * S * D * cond_itemsize            # double-buffered input
        mask = 2 * bb * S * 4
        outp = 2 * bb * Dt * 4
        wts = 2 * (D * Dt * w_itemsize + (3 * D + 5 * Dt) * 4)
        local = 2 * bb * S * D * 4 + 4 * bb * S * 4 + bb * (D + 2 * Dt) * 4
        return cond + mask + outp + wts + local

    cands = [bb for bb in (512, 256, 128, 64, 32, 16, 8)
             if bb <= B and B % bb == 0]                 # multiple of 8, divides B
    for bb in cands:                                     # keep pipeline / 2-TC busy
        if bb <= B // 2 and step_bytes(bb) <= vmem_budget:
            return bb
    for bb in cands:
        if step_bytes(bb) <= vmem_budget:
            return bb
    if cands:
        return cands[-1]
    return B  # tiny / odd batch: single full-batch step (block_b == B is legal)


def text_time_condition_pooling(cond_emb, mask, params, *,
                                block_b=None,
                                matmul_dtype=jnp.bfloat16,
                                approx_recip=True):
    B, S, D = cond_emb.shape
    Dt = params["wp"].shape[1]
    f32 = jnp.float32

    # ---- generation-aware VMEM budget ----
    try:
        vmem_cap = int(pltpu.get_tpu_info().vmem_capacity_bytes)
    except Exception:  # heuristic only; safe conservative default
        vmem_cap = 64 * _MiB
    if vmem_cap <= 64 * _MiB:
        vmem_budget = 40 * _MiB          # v7x-class (64 MiB physical)
    else:
        vmem_budget = 96 * _MiB          # v5e / v6e (128 MiB physical)
    vmem_limit = max(vmem_budget + 8 * _MiB,
                     min(vmem_cap - 8 * _MiB, vmem_budget + 16 * _MiB))

    cond_itemsize = jnp.dtype(cond_emb.dtype).itemsize
    w_itemsize = jnp.dtype(matmul_dtype).itemsize
    if block_b is None:
        block_b = _pick_block_b(B, S, D, Dt, cond_itemsize, w_itemsize, vmem_budget)
    assert B % block_b == 0 and (block_b == B or block_b % 8 == 0)

    # ---- wrapper-side algebraic folding (done once, outside the kernel) ----
    # scores: xn @ (Wk q^T)/sqrt(D); bk.q is softmax-invariant -> dropped.
    kq = (params["q"].astype(f32) @ params["wk"].astype(f32).T) \
        * jnp.float32(1.0 / math.sqrt(D))                              # (1, D)
    wow = params["wo"].astype(f32) @ params["wp"].astype(f32)          # (D, Dt)
    w_full = (params["wv"].astype(f32) @ wow).astype(matmul_dtype)     # (D, Dt)
    bv_full = params["bv"].astype(f32) @ wow                           # (1, Dt)
    bc_full = params["bo"].astype(f32) @ params["wp"].astype(f32) \
        + params["bp"].astype(f32)                                     # (1, Dt)

    mask_f = mask.astype(f32).reshape(B, S)

    kernel = functools.partial(pooling_kernel, approx_recip=approx_recip)

    const2 = lambda shape: pl.BlockSpec(shape, lambda b: (0, 0))
    in_specs = [
        pl.BlockSpec((block_b, S, D), lambda b: (b, 0, 0)),   # cond_emb (native dtype)
        pl.BlockSpec((block_b, S), lambda b: (b, 0)),         # mask (f32)
        const2((1, D)), const2((1, D)),                       # norm1 gamma/beta
        const2((1, D)),                                       # kq
        const2((D, Dt)),                                      # fused Wv@Wo@Wp
        const2((1, Dt)), const2((1, Dt)),                     # bv-fold, const bias
        const2((1, Dt)), const2((1, Dt)),                     # norm2 gamma/beta
    ]
    return pl.pallas_call(
        kernel,
        out_shape=jax.ShapeDtypeStruct((B, Dt), f32),
        grid=(B // block_b,),
        in_specs=in_specs,
        out_specs=pl.BlockSpec((block_b, Dt), lambda b: (b, 0)),
        compiler_params=pltpu.CompilerParams(
            dimension_semantics=("parallel",),
            vmem_limit_bytes=int(vmem_limit)),
    )(cond_emb, mask_f,
      params["g1"].astype(f32), params["b1"].astype(f32),
      kq,
      w_full, bv_full, bc_full,
      params["g2"].astype(f32), params["b2"].astype(f32))


def reference(cond_emb, mask, params):
    """Pure-JAX reference mirroring the (unfused) PyTorch forward semantics."""
    D = cond_emb.shape[-1]
    x = _layernorm(cond_emb.astype(jnp.float32), params["g1"], params["b1"])
    k = jnp.einsum("bsd,de->bse", x, params["wk"]) + params["bk"]
    v = jnp.einsum("bsd,de->bse", x, params["wv"]) + params["bv"]
    scores = jnp.sum(k * params["q"], axis=-1) / math.sqrt(D)            # [B,S]
    scores = jnp.where(mask > 0, scores, -1e30)
    p = jax.nn.softmax(scores, axis=-1) * (mask > 0)
    p = p / jnp.sum(p, axis=-1, keepdims=True)
    pooled = jnp.einsum("bs,bsd->bd", p, v)
    pooled = pooled @ params["wo"] + params["bo"]
    y = pooled @ params["wp"] + params["bp"]
    return _layernorm(y, params["g2"], params["b2"])


def init_params(key, encoder_dim, time_embed_dim):
    ks = jax.random.split(key, 8)
    s = 0.02
    return {
        "g1": jnp.ones((1, encoder_dim), jnp.float32),
        "b1": jnp.zeros((1, encoder_dim), jnp.float32),
        "q":  s * jax.random.normal(ks[0], (1, encoder_dim), jnp.float32),
        "wk": s * jax.random.normal(ks[1], (encoder_dim, encoder_dim), jnp.float32),
        "bk": s * jax.random.normal(ks[2], (1, encoder_dim), jnp.float32),
        "wv": s * jax.random.normal(ks[3], (encoder_dim, encoder_dim), jnp.float32),
        "bv": s * jax.random.normal(ks[4], (1, encoder_dim), jnp.float32),
        "wo": s * jax.random.normal(ks[5], (encoder_dim, encoder_dim), jnp.float32),
        "bo": jnp.zeros((1, encoder_dim), jnp.float32),
        "wp": s * jax.random.normal(ks[6], (encoder_dim, time_embed_dim), jnp.float32),
        "bp": s * jax.random.normal(ks[7], (1, time_embed_dim), jnp.float32),
        "g2": jnp.ones((1, time_embed_dim), jnp.float32),
        "b2": jnp.zeros((1, time_embed_dim), jnp.float32),
    }


if __name__ == "__main__":
    B, S, D_ENC, D_TIME = 2, 8, 32, 32

    key = jax.random.PRNGKey(0)
    k_emb, k_par = jax.random.split(key)

    cond_emb = jax.random.normal(k_emb, (B, S, D_ENC), jnp.float32)
    mask = jnp.array([[1, 1, 1, 1, 1, 1, 1, 1],
                      [1, 1, 1, 1, 1, 0, 0, 0]], jnp.int32)

    params = init_params(k_par, D_ENC, D_TIME)
    ref = reference(cond_emb, mask.astype(jnp.float32), params)

    # (name, cond dtype, kernel config, tolerance vs f32 reference)
    configs = [
        ("f32-exact", jnp.float32,
         dict(matmul_dtype=jnp.float32, approx_recip=False), 1e-4),
        ("f32-approx-recip", jnp.float32,
         dict(matmul_dtype=jnp.float32, approx_recip=True), 5e-3),
        ("bf16-weights", jnp.float32,
         dict(matmul_dtype=jnp.bfloat16, approx_recip=True), 5e-2),
        ("bf16-activations", jnp.bfloat16,
         dict(matmul_dtype=jnp.bfloat16, approx_recip=True), 1e-1),
    ]
    for name, cdt, kw, tol in configs:
        out = text_time_condition_pooling(cond_emb.astype(cdt), mask, params, **kw)
        out = jax.block_until_ready(out)
        assert out.shape == (B, D_TIME), (name, out.shape)
        assert jnp.allclose(out, ref, atol=tol, rtol=tol), \
            f"{name}: max abs err {jnp.max(jnp.abs(out - ref))}"

    print("KERNEL_OK")
</pallas_src>

<mosaic_0001>
module attributes {stable_mosaic.version = 11 : i64} {
  func.func @pooling_kernel(%arg0: i32, %arg1: memref<2x8x32xf32, #tpu.memory_space<vmem>>, %arg2: memref<2x8xf32, #tpu.memory_space<vmem>>, %arg3: memref<1x32xf32, #tpu.memory_space<vmem>>, %arg4: memref<1x32xf32, #tpu.memory_space<vmem>>, %arg5: memref<1x32xf32, #tpu.memory_space<vmem>>, %arg6: memref<32x32xf32, #tpu.memory_space<vmem>>, %arg7: memref<1x32xf32, #tpu.memory_space<vmem>>, %arg8: memref<1x32xf32, #tpu.memory_space<vmem>>, %arg9: memref<1x32xf32, #tpu.memory_space<vmem>>, %arg10: memref<1x32xf32, #tpu.memory_space<vmem>>, %arg11: memref<2x32xf32, #tpu.memory_space<vmem>>) attributes {dimension_semantics = [#tpu.dimension_semantics<parallel>], iteration_bounds = array<i64: 1>, scalar_prefetch = 0 : i64, scratch_operands = 0 : i64, tpu.core_type = #tpu.core_type<tc>, window_params = [{transform_indices = @transform_0, window_bounds = array<i64: 2, 8, 32>}, {transform_indices = @transform_1, window_bounds = array<i64: 2, 8>}, {pipeline_mode = #tpu.pipeline_mode<synchronous>, transform_indices = @transform_2, window_bounds = array<i64: 1, 32>}, {pipeline_mode = #tpu.pipeline_mode<synchronous>, transform_indices = @transform_3, window_bounds = array<i64: 1, 32>}, {pipeline_mode = #tpu.pipeline_mode<synchronous>, transform_indices = @transform_4, window_bounds = array<i64: 1, 32>}, {pipeline_mode = #tpu.pipeline_mode<synchronous>, transform_indices = @transform_5, window_bounds = array<i64: 32, 32>}, {pipeline_mode = #tpu.pipeline_mode<synchronous>, transform_indices = @transform_6, window_bounds = array<i64: 1, 32>}, {pipeline_mode = #tpu.pipeline_mode<synchronous>, transform_indices = @transform_7, window_bounds = array<i64: 1, 32>}, {pipeline_mode = #tpu.pipeline_mode<synchronous>, transform_indices = @transform_8, window_bounds = array<i64: 1, 32>}, {pipeline_mode = #tpu.pipeline_mode<synchronous>, transform_indices = @transform_9, window_bounds = array<i64: 1, 32>}, {transform_indices = @transform_10, window_bounds = array<i64: 2, 32>}]} {
    %c0 = arith.constant 0 : index
    %c0_0 = arith.constant 0 : index
    %c0_1 = arith.constant 0 : index
    %0 = vector.load %arg1[%c0, %c0_0, %c0_1] : memref<2x8x32xf32, #tpu.memory_space<vmem>>, vector<2x8x32xf32>
    %c0_2 = arith.constant 0 : index
    %c0_3 = arith.constant 0 : index
    %1 = vector.load %arg2[%c0_2, %c0_3] : memref<2x8xf32, #tpu.memory_space<vmem>>, vector<2x8xf32>
    %cst = arith.constant 0.000000e+00 : f32
    %2 = vector.broadcast %cst : f32 to vector<2x8xf32>
    %3 = arith.cmpf ogt, %1, %2 : vector<2x8xf32>
    %c0_4 = arith.constant 0 : index
    %c0_5 = arith.constant 0 : index
    %4 = vector.load %arg3[%c0_4, %c0_5] : memref<1x32xf32, #tpu.memory_space<vmem>>, vector<1x32xf32>
    %c0_6 = arith.constant 0 : index
    %c0_7 = arith.constant 0 : index
    %5 = vector.load %arg4[%c0_6, %c0_7] : memref<1x32xf32, #tpu.memory_space<vmem>>, vector<1x32xf32>
    %cst_8 = arith.constant dense<0.000000e+00> : vector<2x8xf32>
    %6 = vector.multi_reduction <add>, %0, %cst_8 [2] : vector<2x8x32xf32> to vector<2x8xf32>
    %7 = vector.shape_cast %6 : vector<2x8xf32> to vector<2x8x1xf32>
    %cst_9 = arith.constant 3.200000e+01 : f32
    %8 = vector.broadcast %cst_9 : f32 to vector<2x8x1xf32>
    %9 = arith.divf %7, %8 : vector<2x8x1xf32>
    %10 = vector.broadcast %9 : vector<2x8x1xf32> to vector<2x8x32xf32>
    %11 = arith.subf %0, %10 : vector<2x8x32xf32>
    %12 = arith.mulf %11, %11 : vector<2x8x32xf32>
    %cst_10 = arith.constant dense<0.000000e+00> : vector<2x8xf32>
    %13 = vector.multi_reduction <add>, %12, %cst_10 [2] : vector<2x8x32xf32> to vector<2x8xf32>
    %14 = vector.shape_cast %13 : vector<2x8xf32> to vector<2x8x1xf32>
    %cst_11 = arith.constant 3.200000e+01 : f32
    %15 = vector.broadcast %cst_11 : f32 to vector<2x8x1xf32>
    %16 = arith.divf %14, %15 : vector<2x8x1xf32>
    %17 = vector.broadcast %9 : vector<2x8x1xf32> to vector<2x8x32xf32>
    %18 = arith.subf %0, %17 : vector<2x8x32xf32>
    %cst_12 = arith.constant 9.99999974E-6 : f32
    %19 = vector.broadcast %cst_12 : f32 to vector<2x8x1xf32>
    %20 = arith.addf %16, %19 : vector<2x8x1xf32>
    %21 = math.rsqrt %20 : vector<2x8x1xf32>
    %22 = vector.broadcast %21 : vector<2x8x1xf32> to vector<2x8x32xf32>
    %23 = arith.mulf %18, %22 : vector<2x8x32xf32>
    %24 = vector.shape_cast %4 : vector<1x32xf32> to vector<1x1x32xf32>
    %25 = vector.broadcast %24 : vector<1x1x32xf32> to vector<2x8x32xf32>
    %26 = arith.mulf %23, %25 : vector<2x8x32xf32>
    %27 = vector.shape_cast %5 : vector<1x32xf32> to vector<1x1x32xf32>
    %28 = vector.broadcast %27 : vector<1x1x32xf32> to vector<2x8x32xf32>
    %29 = arith.addf %26, %28 : vector<2x8x32xf32>
    %c0_13 = arith.constant 0 : index
    %c0_14 = arith.constant 0 : index
    %30 = vector.load %arg5[%c0_13, %c0_14] : memref<1x32xf32, #tpu.memory_space<vmem>>, vector<1x32xf32>
    %31 = vector.shape_cast %30 : vector<1x32xf32> to vector<1x1x32xf32>
    %32 = vector.broadcast %31 : vector<1x1x32xf32> to vector<2x8x32xf32>
    %33 = arith.mulf %29, %32 : vector<2x8x32xf32>
    %cst_15 = arith.constant dense<0.000000e+00> : vector<2x8xf32>
    %34 = vector.multi_reduction <add>, %33, %cst_15 [2] : vector<2x8x32xf32> to vector<2x8xf32>
    %cst_16 = arith.constant -1.000000e+30 : f32
    %35 = vector.broadcast %cst_16 : f32 to vector<2x8xf32>
    %36 = arith.select %3, %34, %35 : vector<2x8xi1>, vector<2x8xf32>
    %cst_17 = arith.constant dense<0xFF800000> : vector<2xf32>
    %37 = vector.multi_reduction <maximumf>, %36, %cst_17 [1] : vector<2x8xf32> to vector<2xf32>
    %38 = vector.shape_cast %37 : vector<2xf32> to vector<2x1xf32>
    %39 = vector.broadcast %38 : vector<2x1xf32> to vector<2x8xf32>
    %40 = arith.subf %36, %39 : vector<2x8xf32>
    %41 = math.exp %40 : vector<2x8xf32>
    %cst_18 = arith.constant 0.000000e+00 : f32
    %42 = vector.broadcast %cst_18 : f32 to vector<2x8xf32>
    %43 = arith.select %3, %41, %42 : vector<2x8xi1>, vector<2x8xf32>
    %cst_19 = arith.constant dense<0.000000e+00> : vector<2xf32>
    %44 = vector.multi_reduction <add>, %43, %cst_19 [1] : vector<2x8xf32> to vector<2xf32>
    %45 = vector.shape_cast %44 : vector<2xf32> to vector<2x1xf32>
    %cst_20 = arith.constant 1.000000e-30 : f32
    %46 = vector.broadcast %cst_20 : f32 to vector<2x1xf32>
    %47 = arith.maximumf %45, %46 : vector<2x1xf32>
    %48 = vector.broadcast %47 : vector<2x1xf32> to vector<2x8xf32>
    %49 = arith.divf %43, %48 : vector<2x8xf32>
    %cst_21 = arith.constant dense<0.000000e+00> : vector<2xf32>
    %50 = vector.multi_reduction <add>, %49, %cst_21 [1] : vector<2x8xf32> to vector<2xf32>
    %51 = vector.shape_cast %50 : vector<2xf32> to vector<2x1xf32>
    %52 = vector.shape_cast %49 : vector<2x8xf32> to vector<2x8x1xf32>
    %53 = vector.broadcast %52 : vector<2x8x1xf32> to vector<2x8x32xf32>
    %54 = arith.mulf %53, %29 : vector<2x8x32xf32>
    %cst_22 = arith.constant dense<0.000000e+00> : vector<2x32xf32>
    %55 = vector.multi_reduction <add>, %54, %cst_22 [1] : vector<2x8x32xf32> to vector<2x32xf32>
    %c0_23 = arith.constant 0 : index
    %c0_24 = arith.constant 0 : index
    %56 = vector.load %arg6[%c0_23, %c0_24] : memref<32x32xf32, #tpu.memory_space<vmem>>, vector<32x32xf32>
    %cst_25 = arith.constant dense<0.000000e+00> : vector<2x32xf32>
    %57 = tpu.matmul %55, %56, %cst_25 {dimension_numbers = #tpu.dot_dimension_numbers<[1], [0], [0], [1], [0, 0, 1, 1], [], []>} : vector<2x32xf32>, vector<32x32xf32>, vector<2x32xf32> -> vector<2x32xf32>
    %c0_26 = arith.constant 0 : index
    %c0_27 = arith.constant 0 : index
    %58 = vector.load %arg7[%c0_26, %c0_27] : memref<1x32xf32, #tpu.memory_space<vmem>>, vector<1x32xf32>
    %59 = vector.broadcast %51 : vector<2x1xf32> to vector<2x32xf32>
    %60 = vector.broadcast %58 : vector<1x32xf32> to vector<2x32xf32>
    %61 = arith.mulf %59, %60 : vector<2x32xf32>
    %62 = arith.addf %57, %61 : vector<2x32xf32>
    %c0_28 = arith.constant 0 : index
    %c0_29 = arith.constant 0 : index
    %63 = vector.load %arg8[%c0_28, %c0_29] : memref<1x32xf32, #tpu.memory_space<vmem>>, vector<1x32xf32>
    %64 = vector.broadcast %63 : vector<1x32xf32> to vector<2x32xf32>
    %65 = arith.addf %62, %64 : vector<2x32xf32>
    %c0_30 = arith.constant 0 : index
    %c0_31 = arith.constant 0 : index
    %66 = vector.load %arg9[%c0_30, %c0_31] : memref<1x32xf32, #tpu.memory_space<vmem>>, vector<1x32xf32>
    %c0_32 = arith.constant 0 : index
    %c0_33 = arith.constant 0 : index
    %67 = vector.load %arg10[%c0_32, %c0_33] : memref<1x32xf32, #tpu.memory_space<vmem>>, vector<1x32xf32>
    %cst_34 = arith.constant dense<0.000000e+00> : vector<2xf32>
    %68 = vector.multi_reduction <add>, %65, %cst_34 [1] : vector<2x32xf32> to vector<2xf32>
    %69 = vector.shape_cast %68 : vector<2xf32> to vector<2x1xf32>
    %cst_35 = arith.constant 3.200000e+01 : f32
    %70 = vector.broadcast %cst_35 : f32 to vector<2x1xf32>
    %71 = arith.divf %69, %70 : vector<2x1xf32>
    %72 = vector.broadcast %71 : vector<2x1xf32> to vector<2x32xf32>
    %73 = arith.subf %65, %72 : vector<2x32xf32>
    %74 = arith.mulf %73, %73 : vector<2x32xf32>
    %cst_36 = arith.constant dense<0.000000e+00> : vector<2xf32>
    %75 = vector.multi_reduction <add>, %74, %cst_36 [1] : vector<2x32xf32> to vector<2xf32>
    %76 = vector.shape_cast %75 : vector<2xf32> to vector<2x1xf32>
    %cst_37 = arith.constant 3.200000e+01 : f32
    %77 = vector.broadcast %cst_37 : f32 to vector<2x1xf32>
    %78 = arith.divf %76, %77 : vector<2x1xf32>
    %79 = vector.broadcast %71 : vector<2x1xf32> to vector<2x32xf32>
    %80 = arith.subf %65, %79 : vector<2x32xf32>
    %cst_38 = arith.constant 9.99999974E-6 : f32
    %81 = vector.broadcast %cst_38 : f32 to vector<2x1xf32>
    %82 = arith.addf %78, %81 : vector<2x1xf32>
    %83 = math.rsqrt %82 : vector<2x1xf32>
    %84 = vector.broadcast %83 : vector<2x1xf32> to vector<2x32xf32>
    %85 = arith.mulf %80, %84 : vector<2x32xf32>
    %86 = vector.broadcast %66 : vector<1x32xf32> to vector<2x32xf32>
    %87 = arith.mulf %85, %86 : vector<2x32xf32>
    %88 = vector.broadcast %67 : vector<1x32xf32> to vector<2x32xf32>
    %89 = arith.addf %87, %88 : vector<2x32xf32>
    %c0_39 = arith.constant 0 : index
    %c0_40 = arith.constant 0 : index
    %90 = vector.load %arg11[%c0_39, %c0_40] : memref<2x32xf32, #tpu.memory_space<vmem>>, vector<2x32xf32>
    tpu.vector_store %arg11[%c0_39, %c0_40], %89 {strides = array<i32>} : memref<2x32xf32, #tpu.memory_space<vmem>>, vector<2x32xf32>,
    return
  }
  func.func @transform_0(%arg0: i32) -> (i32, i32, i32) {
    %c0_i32 = arith.constant 0 : i32
    %c0_i32_0 = arith.constant 0 : i32
    %c0_i32_1 = arith.constant 0 : i32
    return %arg0, %c0_i32, %c0_i32_0 : i32, i32, i32
  }
  func.func @transform_1(%arg0: i32) -> (i32, i32) {
    %c0_i32 = arith.constant 0 : i32
    %c0_i32_0 = arith.constant 0 : i32
    return %arg0, %c0_i32 : i32, i32
  }
  func.func @transform_2(%arg0: i32) -> (i32, i32) {
    %c0_i32 = arith.constant 0 : i32
    %c0_i32_0 = arith.constant 0 : i32
    %c0_i32_1 = arith.constant 0 : i32
    return %c0_i32, %c0_i32_0 : i32, i32
  }
  func.func @transform_3(%arg0: i32) -> (i32, i32) {
    %c0_i32 = arith.constant 0 : i32
    %c0_i32_0 = arith.constant 0 : i32
    %c0_i32_1 = arith.constant 0 : i32
    return %c0_i32, %c0_i32_0 : i32, i32
  }
  func.func @transform_4(%arg0: i32) -> (i32, i32) {
    %c0_i32 = arith.constant 0 : i32
    %c0_i32_0 = arith.constant 0 : i32
    %c0_i32_1 = arith.constant 0 : i32
    return %c0_i32, %c0_i32_0 : i32, i32
  }
  func.func @transform_5(%arg0: i32) -> (i32, i32) {
    %c0_i32 = arith.constant 0 : i32
    %c0_i32_0 = arith.constant 0 : i32
    %c0_i32_1 = arith.constant 0 : i32
    return %c0_i32, %c0_i32_0 : i32, i32
  }
  func.func @transform_6(%arg0: i32) -> (i32, i32) {
    %c0_i32 = arith.constant 0 : i32
    %c0_i32_0 = arith.constant 0 : i32
    %c0_i32_1 = arith.constant 0 : i32
    return %c0_i32, %c0_i32_0 : i32, i32
  }
  func.func @transform_7(%arg0: i32) -> (i32, i32) {
    %c0_i32 = arith.constant 0 : i32
    %c0_i32_0 = arith.constant 0 : i32
    %c0_i32_1 = arith.constant 0 : i32
    return %c0_i32, %c0_i32_0 : i32, i32
  }
  func.func @transform_8(%arg0: i32) -> (i32, i32) {
    %c0_i32 = arith.constant 0 : i32
    %c0_i32_0 = arith.constant 0 : i32
    %c0_i32_1 = arith.constant 0 : i32
    return %c0_i32, %c0_i32_0 : i32, i32
  }
  func.func @transform_9(%arg0: i32) -> (i32, i32) {
    %c0_i32 = arith.constant 0 : i32
    %c0_i32_0 = arith.constant 0 : i32
    %c0_i32_1 = arith.constant 0 : i32
    return %c0_i32, %c0_i32_0 : i32, i32
  }
  func.func @transform_10(%arg0: i32) -> (i32, i32) {
    %c0_i32 = arith.constant 0 : i32
    %c0_i32_0 = arith.constant 0 : i32
    return %arg0, %c0_i32 : i32, i32
  }
}

</mosaic_0001>

<bundles_post_ra>
// kernel: tpu_custom_call.1
= control target key start
LH: loop header
LB: loop body
LE: loop exit
PB: predicated region body
PF: predicated region fallthrough
CT: control target
= control target key end

     0   :  { %15 = vsyncpa [#allocation3], 0  ;;  %s598_s0 = inlined_call_operand.hbm [shape: f32[2,8,32], index: 0, kind: input, shape index: {}]   ;;  %s599_s1 = inlined_call_operand.vmem [shape: f32[2,8], index: 1, kind: input, shape index: {}]   ;;  %s600_s2 = inlined_call_operand.vmem [shape: f32[1,32], index: 2, kind: input, shape index: {}]   ;;  %s601_s3 = inlined_call_operand.vmem [shape: f32[1,32], index: 3, kind: input, shape index: {}]   ;;  %s602_s4 = inlined_call_operand.vmem [shape: f32[1,32], index: 4, kind: input, shape index: {}]   ;;  %s603_s5 = inlined_call_operand.hbm [shape: f32[32,32], index: 5, kind: input, shape index: {}]   ;;  %s604_s6 = inlined_call_operand.vmem [shape: f32[1,32], index: 6, kind: input, shape index: {}]   ;;  %s605_s7 = inlined_call_operand.vmem [shape: f32[1,32], index: 7, kind: input, shape index: {}]   ;;  %s606_s8 = inlined_call_operand.vmem [shape: f32[1,32], index: 8, kind: input, shape index: {}]   ;;  %s607_s9 = inlined_call_operand.vmem [shape: f32[1,32], index: 9, kind: input, shape index: {}]   ;;  %s608_s10 = inlined_call_operand.hbm [shape: f32[2,32], index: 10, kind: output, shape index: {}]  }
   0x1   :  { %16 = vsyncpa [#allocation6], 0 }
   0x2   :  { %17 = vsyncpa [#allocation4], 0  ;;  %s454_s13 = smov [#allocation2]   ;;  %s382_s17 = scalar_lea.hbm %s598_s0, 256 }
   0x3   :  { %s23_s14 = sshll.u32 %s454_s13, 4  ;;  %p383_p0 = scmp.ne.s32.totalorder %s598_s0, %s382_s17  ;;  %s24_s14 = int_to_ptr.vmem [resolvable:$true] %s23_s14 }
   0x4   :  { %p386_p1 = scmp.lt.u32.totalorder %s382_s17, %s598_s0 }
   0x6   :  { %p388_p2 = pnand %p386_p1, %p383_p0 }
   0x8   :  { %391 = shalt.err (!%p388_p2)
}
   0x9   :  { %s392_s22 = scalar_lea.vmem %s24_s14, 256  ;;  %p397_p4 = scmp.lt.s32.totalorder %s24_s14, %s24_s14 }
   0xa   :  { %p393_p3 = scmp.ne.s32.totalorder %s24_s14, %s392_s22  ;;  %p398_p5 = scmp.lt.s32.totalorder %s392_s22, %s392_s22 }
   0xc   :  { %p399_p6 = por %p398_p5, %p397_p4 }
   0xe   :  { %p400_p7 = pnand %p399_p6, %p393_p3 }
  0x10   :  { %403 = shalt.err (!%p400_p7)
}
  0x11   :  { %s455_s23 = smov 128   ;;  %s456_s24 = smov 8  }
  0x12   :  { %29 = dma.hbm_to_vmem [thread:$0]  %s598_s0, 256, %s24_s14, [#allocation3], %s455_s23, %s455_s23, %s456_s24  }
  0x13   :  { %s457_s27 = smov [#allocation5]   ;;  %s404_s11 = scalar_lea.hbm %s603_s5, 512 }
  0x14   :  { %s43_s28 = sshll.u32 %s457_s27, 4  ;;  %p405_p8 = scmp.ne.s32.totalorder %s603_s5, %s404_s11  ;;  %s44_s28 = int_to_ptr.vmem [resolvable:$true] %s43_s28 }
  0x15   :  { %p408_p9 = scmp.lt.u32.totalorder %s404_s11, %s603_s5 }
  0x17   :  { %p410_p10 = pnand %p408_p9, %p405_p8 }
  0x19   :  { %413 = shalt.err (!%p410_p10)
}
  0x1a   :  { %s414_s17 = scalar_lea.vmem %s44_s28, 512  ;;  %p419_p12 = scmp.lt.s32.totalorder %s44_s28, %s44_s28 }
  0x1b   :  { %p415_p11 = scmp.ne.s32.totalorder %s44_s28, %s414_s17  ;;  %p420_p13 = scmp.lt.s32.totalorder %s414_s17, %s414_s17 }
  0x1d   :  { %p421_p0 = por %p420_p13, %p419_p12 }
  0x1f   :  { %p422_p1 = pnand %p421_p0, %p415_p11 }
  0x21   :  { %425 = shalt.err (!%p422_p1)
}
  0x22   :  { %49 = dma.hbm_to_vmem [thread:$0]  %s603_s5, 512, %s44_s28, [#allocation6], %s455_s23, %s455_s23, %s456_s24  }
  0x23   :  { %448 = dma.done.wait [#allocation3], 256  }
  0x24   :  { %449 = vsyncadd [#allocation3], 4294967040 }
  0x25   :  { %450 = dma.done.wait [#allocation6], 512  }
  0x26   :  { %451 = vsyncadd [#allocation6], 4294966784  ;;  %vm70_vm0 = vcmask 261120   ;;  %v64_v0 = vld [vmem:[#allocation2] sm:$0xff]  ;;  %v65_v1 = vld [vmem:[#allocation2 + $0x8] sm:$0xff]  ;;  %v131_v35 = vlaneseq  ;;  %vm141_vm1 = vcmask 1041409  }
  0x27   :  { %v71_v2 = vsel %vm70_vm0, %v64_v0, 0.0  ;;  %v74_v3 = vsel %vm70_vm0, %v65_v1, 0.0  ;;  %v334_v21 = vld [vmem:[%s600_s2] ss:$0 sm:$0xff]  ;;  %vm145_vm3 = vcmask 58368   ;;  %v192_v55 = vld [vmem:[#allocation5] sm:$0xff] }
  0x28   :  { %72 = vadd.xlane.f32.xlu0 %v71_v2  ;;  %v335_v23 = vld [vmem:[%s601_s3] ss:$0 sm:$0xff]  ;;  %v132_v36 = vand.u32 127, %v131_v35  ;;  %v134_v37 = vshrl.u32 %v131_v35, 7  ;;  %v193_v56 = vld [vmem:[#allocation5 + $0x8] sm:$0xff]  ;;  %v458_v61 = vmov 0.0|0.0  }
  0x29   :  { %v336_v26 = vld [vmem:[%s602_s4] ss:$0 sm:$0xff]  ;;  %v359_v59 = vpack.c.bf16 %v193_v56, %v192_v55  ;;  %358 = vmatprep.subr.bf16.mxu0 %v458_v61  ;;  %vm459_vm4 = vmmov 0   ;;  %vm289_vm5 = vcmask 254976   ;;  %s461_s27 = smov [#allocation7]  }
  0x2a   :  { %v135_v38 = vsub.s32 %v132_v36, %v134_v37  ;;  %v66_v40 = vld [vmem:[%s599_s1] sm:$0x3]  ;;  %v171_v57 = vsub.s32 1, %v134_v37  ;;  %v164_v58 = vsub.s32 0, %v134_v37  ;;  %s324_s28 = sshll.u32 %s461_s27, 4  ;;  %s325_s28 = int_to_ptr.vmem [resolvable:$true] %s324_s28 }
  0x2b   :  { %vm67_vm2 = vcmp.gt.f32.partialorder %v66_v40, 0.0  ;;  %360 = vmatpush3.bf16.msra.mxu0 %v359_v59  ;;  %v194_v63 = vld [vmem:[#allocation5 + $0x10] sm:$0xff]  ;;  %s426_s29 = scalar_lea.vmem %s325_s28, 32  ;;  %p431_p3 = scmp.lt.s32.totalorder %s325_s28, %s325_s28 }
  0x2c   :  { %75 = vadd.xlane.f32.xlu0 %v74_v3  ;;  %361 = vmatprep.subr.bf16.mxu0 %v458_v61  ;;  %p427_p2 = scmp.ne.s32.totalorder %s325_s28, %s426_s29  ;;  %p432_p4 = scmp.lt.s32.totalorder %s426_s29, %s426_s29 }
  0x2e   :  { %p433_p5 = por %p432_p4, %p431_p3 }
  0x30   :  { %p434_p6 = pnand %p433_p5, %p427_p2 }
  0xb5   :  { %v73_v4 = vpop.xlane.xlu0 %72 }
  0xb6   :  { %v78_v5 = vmul.f32 0.03125, %v73_v4  ;;  %v460_v4 = vmov 0.0  }
  0xb7   :  { %355 = vmatprep.mubr.msk.f32.mxu0 %vm459_vm4, %v460_v4 }
  0xb8   :  { %v80_v6 = vsub.f32 %v64_v0, %v78_v5  ;;  %v195_v0 = vld [vmem:[#allocation5 + $0x18] sm:$0xff] }
  0xb9   :  { %v76_v7 = vpop.xlane.xlu0 %75  ;;  %v362_v3 = vpack.c.bf16 %v195_v0, %v194_v63 }
  0xba   :  { %v79_v8 = vmul.f32 0.03125, %v76_v7  ;;  %v82_v9 = vmul.f32 %v80_v6, %v80_v6 }
  0xbb   :  { %363 = vmatpush3.bf16.msra.mxu0 %v362_v3 }
  0xbc   :  { %v81_v10 = vsub.f32 %v65_v1, %v79_v8  ;;  %v84_v11 = vsel %vm70_vm0, %v82_v9, 0.0 }
  0xbd   :  { %85 = vadd.xlane.f32.xlu1 %v84_v11 }
  0xbe   :  { %v83_v12 = vmul.f32 %v81_v10, %v81_v10 }
  0xc0   :  { %v87_v13 = vsel %vm70_vm0, %v83_v12, 0.0 }
  0xc1   :  { %88 = vadd.xlane.f32.xlu1 %v87_v13 }
 0x14a   :  { %v86_v14 = vpop.xlane.xlu1 %85 }
 0x14b   :  { %v90_v15 = vmul.f32 0.03125, %v86_v14 }
 0x14d   :  { %v92_v16 = vadd.f32 1e-05, %v90_v15 }
 0x14e   :  { %v89_v17 = vpop.xlane.xlu1 %88 }
 0x14f   :  { %372 = vrsqrt.f32 %v92_v16  ;;  %v91_v18 = vmul.f32 0.03125, %v89_v17 }
 0x151   :  { %v93_v19 = vadd.f32 1e-05, %v91_v18 }
 0x153   :  { %374 = vrsqrt.f32 %v93_v19 }
 0x159   :  { %v373_v20 = vpop.eup %372 }
 0x15a   :  { %v96_v22 = vmul.f32 %v373_v20, %v80_v6 }
 0x15c   :  { %v104_v24 = vmul.f32 %v334_v21, %v96_v22 }
 0x15d   :  { %v375_v25 = vpop.eup %374 }
 0x15e   :  { %v554_v27 = vadd.f32 %v335_v23, %v104_v24  ;;  %v97_v28 = vmul.f32 %v375_v25, %v81_v10  ;;  %v337_v25 = vld [vmem:[%s604_s6] ss:$0 sm:$0xff] }
 0x160   :  { %v121_v29 = vmul.f32 %v336_v26, %v554_v27  ;;  %v105_v30 = vmul.f32 %v334_v21, %v97_v28 }
 0x162   :  { %v123_v31 = vsel %vm70_vm0, %v121_v29, 0.0  ;;  %v113_v32 = vadd.f32 %v335_v23, %v105_v30  ;;  %v339_v29 = vld [vmem:[%s605_s7] ss:$0 sm:$0xff] }
 0x163   :  { %124 = vadd.xlane.f32.xlu0 %v123_v31 }
 0x164   :  { %v122_v33 = vmul.f32 %v336_v26, %v113_v32 }
 0x166   :  { %v126_v34 = vsel %vm70_vm0, %v122_v33, 0.0 }
 0x167   :  { %127 = vadd.xlane.f32.xlu1 %v126_v34 }
 0x1f0   :  { %v125_v39 = vpop.xlane.xlu0 %124 }
 0x1f1   :  { %v136_v42 = vrot.slane %v125_v39, %v135_v38 }
 0x1f4   :  { %v128_v41 = vpop.xlane.xlu1 %127 }
 0x1f5   :  { %v140_v43 = vrot.slane %v128_v41, %v135_v38 }
 0x1f7   :  { %v142_v44 = vsel %vm141_vm1, %v140_v43, %v136_v42  ;;  %v340_v43 = vld [vmem:[%s606_s8] ss:$0 sm:$0xff] }
 0x1f8   :  { %v144_v45 = vsel %vm67_vm2, %v142_v44, -1e+30 }
 0x1f9   :  { %v146_v46 = vsel %vm145_vm3, %v144_v45, -inf }
 0x1fa   :  { %147 = vmax.xlane.f32.xlu0 %v146_v46 }
 0x287   :  { %v148_v47 = vpop.xlane.xlu0 %147 }
 0x288   :  { %v149_v48 = vsub.f32 %v144_v45, %v148_v47  ;;  %v341_v45 = vld [vmem:[%s607_s9] ss:$0 sm:$0xff] }
 0x28a   :  { %v150_v49 = vmul.f32 1.442695, %v149_v48 }
 0x28c   :  { %376 = vpow2.f32 %v150_v49 }
 0x296   :  { %v377_v50 = vpop.eup %376 }
 0x297   :  { %v152_v51 = vsel %vm67_vm2, %v377_v50, 0.0 }
 0x298   :  { %v153_v52 = vsel %vm145_vm3, %v152_v51, 0.0 }
 0x299   :  { %154 = vadd.xlane.f32.xlu1 %v153_v52 }
 0x326   :  { %v155_v53 = vpop.xlane.xlu1 %154 }
 0x327   :  { %v156_v54 = vmax.f32 %v155_v53, 1e-30 }
 0x329   :  { %378 = vrcp.f32 %v156_v54 }
 0x333   :  { %v379_v60 = vpop.eup %378 }
 0x334   :  { %v158_v62 = vmul.f32 %v379_v60, %v152_v51 }
 0x336   :  { %v172_v1 = vrot.slane %v158_v62, %v171_v57  ;;  %v165_v2 = vrot.slane %v158_v62, %v164_v58  ;;  %v159_v5 = vsel %vm145_vm3, %v158_v62, 0.0 }
 0x338   :  { %174 = vbcast.lane.b32.xlu1 %v172_v1, 256  ;;  %167 = vbcast.lane.b32.xlu0 %v165_v2, 256 }
 0x35c   :  { %160 = vadd.xlane.f32.xlu1 %v159_v5 }
 0x3aa   :  { %v175_v6 = vpop.permute.xlu1 %174  ;;  %v168_v7 = vpop.permute.xlu0 %167 }
 0x3ab   :  { %v177_v8 = vmul.f32 %v175_v6, %v113_v32  ;;  %v176_v9 = vmul.f32 %v168_v7, %v554_v27 }
 0x3ad   :  { %v185_v10 = vsel %vm70_vm0, %v177_v8, 0.0  ;;  %v178_v11 = vsel %vm70_vm0, %v176_v9, 0.0 }
 0x3ae   :  { %v186_v12 = vrot.slane %v185_v10, 4  ;;  %v179_v13 = vrot.slane %v178_v11, 4 }
 0x3b0   :  { %v187_v14 = vadd.f32 %v186_v12, %v185_v10  ;;  %v180_v15 = vadd.f32 %v179_v13, %v178_v11 }
 0x3b2   :  { %v188_v16 = vrot.slane %v187_v14, 2  ;;  %v181_v17 = vrot.slane %v180_v15, 2 }
 0x3b4   :  { %v189_v18 = vadd.f32 %v188_v16, %v187_v14  ;;  %v182_v19 = vadd.f32 %v181_v17, %v180_v15 }
 0x3b6   :  { %v190_v20 = vrot.slane %v189_v18, 1  ;;  %v183_v21 = vrot.slane %v182_v19, 1 }
 0x3b8   :  { %v191_v22 = vadd.f32 %v190_v20, %v189_v18  ;;  %v184_v23 = vadd.f32 %v183_v21, %v182_v19 }
 0x3ba   :  { %v206_v24 = vsel %vm141_vm1, %v191_v22, %v184_v23 }
 0x3bb   :  { %356 = vmatmul.mubr.msk.f32.vlgmr.msra.gmra.mrb[0].mxu0 %vm70_vm0, %v206_v24 }
 0x3e9   :  { %v161_v26 = vpop.xlane.xlu1 %160 }
 0x3ea   :  { %v203_v27 = vmul.f32 %v337_v25, %v161_v26 }
 0x48e   :  { %v275_v28 = vpop.f32.mrb[0].mxu0 }
 0x48f   :  { %v276_v30 = vadd.f32 %v275_v28, %v203_v27  ;;  %v357_v31 = vpop.f32.mrb[1].mxu0 }
 0x491   :  { %v286_v32 = vadd.f32 %v339_v29, %v276_v30 }
 0x493   :  { %v290_v33 = vsel %vm289_vm5, %v286_v32, 0.0 }
 0x494   :  { %291 = vadd.xlane.f32.xlu0 %v290_v33 }
 0x521   :  { %v292_v34 = vpop.xlane.xlu0 %291 }
 0x522   :  { %v293_v35 = vmul.f32 0.03125, %v292_v34 }
 0x524   :  { %v294_v36 = vsub.f32 %v286_v32, %v293_v35 }
 0x526   :  { %v295_v37 = vmul.f32 %v294_v36, %v294_v36 }
 0x528   :  { %v296_v38 = vsel %vm289_vm5, %v295_v37, 0.0 }
 0x529   :  { %297 = vadd.xlane.f32.xlu0 %v296_v38 }
 0x5b6   :  { %v298_v39 = vpop.xlane.xlu0 %297 }
 0x5b7   :  { %v299_v40 = vmul.f32 0.03125, %v298_v39 }
 0x5b9   :  { %v300_v41 = vadd.f32 1e-05, %v299_v40 }
 0x5bb   :  { %380 = vrsqrt.f32 %v300_v41 }
 0x5c5   :  { %v381_v42 = vpop.eup %380 }
 0x5c6   :  { %v302_v44 = vmul.f32 %v381_v42, %v294_v36 }
 0x5c8   :  { %v309_v46 = vmul.f32 %v340_v43, %v302_v44 }
 0x5ca   :  { %v316_v47 = vadd.f32 %v341_v45, %v309_v46 }
 0x5cc   :  { %317 = vst.msk [vmem:[#allocation7] sm:$0x3] %vm289_vm5, %v316_v47 }
 0x5cd   :  { %437 = shalt.err (!%p434_p6)
}
 0x5ce   :  { %s438_s11 = scalar_lea.hbm %s608_s10, 32 }
 0x5cf   :  { %p439_p7 = scmp.ne.s32.totalorder %s608_s10, %s438_s11  ;;  %p442_p8 = scmp.lt.u32.totalorder %s438_s11, %s608_s10 }
 0x5d1   :  { %p444_p9 = pnand %p442_p8, %p439_p7 }
 0x5d3   :  { %447 = shalt.err (!%p444_p9)
}
 0x5d4   :  { %327 = dma.vmem_to_hbm [thread:$0]  %s325_s28, 32, %s608_s10, [#allocation4]  }
 0x5d5   :  { %452 = dma.done.wait [#allocation4], 32  }
 0x5d6   :  { %453 = vsyncadd [#allocation4], 4294967264 }
 0x5d7   :  { %331 = vsyncpa [#allocation3], 1 }
 0x5d8   :  { %332 = vsyncpa [#allocation6], 1 }
 0x5d9   :  { %333 = vsyncpa [#allocation4], 1 }

</bundles_post_ra>
